<compile_context>
chip_gen: v6e
topology: v6e:2x2x1
jax: 0.10.0
libtpu: 0.0.40
codegen_flags: <defaults>
</compile_context>

<pallas_src>
import math
import functools

import jax
import jax.numpy as jnp
from jax.experimental import pallas as pl
from jax.experimental.pallas import tpu as pltpu


def _round_up(x, m):
    return ((x + m - 1) // m) * m


def _inte_rand_gaus_kernel(x_ref, w_ref, ev_ref, o_ref, *, dim):
    # x_ref:  (tm, dim)        -- coordinate tile
    # w_ref:  (dim, pe_dim)    -- randomized frequency matrix (2*pi*N(0, sigma^2))
    # ev_ref: (1, pe_dim)      -- exp(-0.5 * sum_i covar[i] * W[i]^2)
    # o_ref:  (tm, 2*pe_dim)
    x = x_ref[...].astype(jnp.float32)
    w = w_ref[...].astype(jnp.float32)
    ev = ev_ref[...].astype(jnp.float32)  # read once; broadcasts over rows

    # dim is tiny (e.g. 3): unrolled broadcast mul-adds on the VPU.  The VALU slots
    # are otherwise idle here (the hot units are EUP for cos/sin and the store path),
    # so this contraction is effectively free; an MXU matmul with K=3 would not be.
    enc = x[:, 0:1] * w[0:1, :]
    for i in range(1, dim):
        enc = enc + x[:, i:i + 1] * w[i:i + 1, :]

    c = jnp.cos(enc) * ev
    s = jnp.sin(enc) * ev
    # Single contiguous store of the whole output tile (avoids the two offset
    # half-writes that produced masked vst.msk partial stores).
    o_ref[...] = jnp.concatenate([c, s], axis=-1).astype(o_ref.dtype)


@functools.partial(jax.jit, static_argnames=("tm",))
def inte_rand_gaus_pallas(coords, mappings, exp_var, *, tm=1024):
    """coords: [..., dim]  ->  [..., 2*pe_dim]"""
    dim = coords.shape[-1]
    pe_dim = mappings.shape[-1]
    lead_shape = coords.shape[:-1]

    x = coords.reshape(-1, dim)
    n = x.shape[0]

    # Effective row tile: at most `tm`, 8-row aligned, and shrink for small N so the
    # demo doesn't pad 16 rows up to 1024.  Pad N to a multiple of the tile and slice
    # the padding off the output (padded rows compute finite garbage that is dropped).
    tm_eff = min(tm, _round_up(max(n, 1), 8))
    n_pad = _round_up(n, tm_eff)
    if n_pad != n:
        x = jnp.pad(x, ((0, n_pad - n), (0, 0)))

    ev2d = exp_var.reshape(1, pe_dim)

    kernel = functools.partial(_inte_rand_gaus_kernel, dim=dim)

    out = pl.pallas_call(
        kernel,
        out_shape=jax.ShapeDtypeStruct((n_pad, 2 * pe_dim), coords.dtype),
        grid_spec=pltpu.PrefetchScalarGridSpec(
            num_scalar_prefetch=0,
            grid=(n_pad // tm_eff,),
            in_specs=[
                pl.BlockSpec((tm_eff, dim), lambda i: (i, 0)),
                pl.BlockSpec((dim, pe_dim), lambda i: (0, 0)),
                pl.BlockSpec((1, pe_dim), lambda i: (0, 0)),
            ],
            out_specs=pl.BlockSpec((tm_eff, 2 * pe_dim), lambda i: (i, 0)),
        ),
        compiler_params=pltpu.CompilerParams(
            # Parallel row-grid: no-op on single-TC chips (v5e/v6e), shards the
            # N/tm loop across both TensorCores on v7x.
            dimension_semantics=("parallel",),
        ),
    )(x, mappings, ev2d)

    out = out[:n]
    return out.reshape(*lead_shape, 2 * pe_dim)


def make_params(dim, pe_dim_arg, gaus_sigma, covar, key):
    """Deterministic stand-in for InteRandGaus.__init__ parameter construction.

    Matches the PyTorch module: weights ~ N(0, (sigma^2)^2) i.e. std = sigma**2,
    scaled by 2*pi; exp_var = exp(-0.5 * sum_i covar[i] * mappings[i]^2).
    """
    pe_dim = pe_dim_arg // 2
    w = jax.random.normal(key, (dim, pe_dim), dtype=jnp.float32) * (gaus_sigma ** 2)
    mappings = 2.0 * math.pi * w
    covar = jnp.asarray(covar, dtype=jnp.float32)
    covar_lifted = (mappings ** 2) * covar[:, None]
    exp_var = jnp.exp(-0.5 * jnp.sum(covar_lifted, axis=0)).astype(jnp.float32)
    return mappings, exp_var


def reference_forward(coords, mappings, exp_var):
    enc = jnp.einsum("...d,dp->...p", coords, mappings)
    return jnp.concatenate(
        [jnp.cos(enc) * exp_var, jnp.sin(enc) * exp_var], axis=-1
    )


if __name__ == "__main__":
    key = jax.random.PRNGKey(0)
    k_w, k_x = jax.random.split(key)

    # Small shapes consistent with the module: coords [bsz, nsmpl, dim]
    bsz, nsmpl, dim = 2, 8, 3
    pe_dim_arg = 64          # module halves this internally -> pe_dim = 32
    gaus_sigma = 1.0
    pe_factor = 1.0          # unused in forward (kept for parity with __init__)
    covar = [0.1, 0.2, 0.3]  # per-dim variance

    mappings, exp_var = make_params(dim, pe_dim_arg, gaus_sigma, covar, k_w)
    coords = jax.random.uniform(k_x, (bsz, nsmpl, dim), dtype=jnp.float32)

    out = inte_rand_gaus_pallas(coords, mappings, exp_var)
    out = jax.block_until_ready(out)

    ref = reference_forward(coords, mappings, exp_var)
    assert out.shape == (bsz, nsmpl, pe_dim_arg)
    assert jnp.allclose(out, ref, atol=1e-5, rtol=1e-5), "mismatch vs reference"

    # Also exercise a non-tile-multiple, larger N to verify the padding path.
    coords_big = jax.random.uniform(jax.random.PRNGKey(1), (3, 1000, dim), dtype=jnp.float32)
    out_big = jax.block_until_ready(inte_rand_gaus_pallas(coords_big, mappings, exp_var))
    ref_big = reference_forward(coords_big, mappings, exp_var)
    assert out_big.shape == (3, 1000, pe_dim_arg)
    assert jnp.allclose(out_big, ref_big, atol=1e-5, rtol=1e-5), "mismatch vs reference (big)"

    print("KERNEL_OK")
</pallas_src>

<mosaic_0001>
module attributes {stable_mosaic.version = 11 : i64} {
  func.func @_inte_rand_gaus_kernel(%arg0: i32, %arg1: memref<16x3xf32, #tpu.memory_space<vmem>>, %arg2: memref<3x32xf32, #tpu.memory_space<vmem>>, %arg3: memref<1x32xf32, #tpu.memory_space<vmem>>, %arg4: memref<16x64xf32, #tpu.memory_space<vmem>>) attributes {dimension_semantics = [#tpu.dimension_semantics<parallel>], iteration_bounds = array<i64: 1>, scalar_prefetch = 0 : i64, scratch_operands = 0 : i64, tpu.core_type = #tpu.core_type<tc>, window_params = [{transform_indices = @transform_0, window_bounds = array<i64: 16, 3>}, {pipeline_mode = #tpu.pipeline_mode<synchronous>, transform_indices = @transform_1, window_bounds = array<i64: 3, 32>}, {pipeline_mode = #tpu.pipeline_mode<synchronous>, transform_indices = @transform_2, window_bounds = array<i64: 1, 32>}, {transform_indices = @transform_3, window_bounds = array<i64: 16, 64>}]} {
    %c0 = arith.constant 0 : index
    %c0_0 = arith.constant 0 : index
    %0 = vector.load %arg1[%c0, %c0_0] : memref<16x3xf32, #tpu.memory_space<vmem>>, vector<16x3xf32>
    %c0_1 = arith.constant 0 : index
    %c0_2 = arith.constant 0 : index
    %1 = vector.load %arg2[%c0_1, %c0_2] : memref<3x32xf32, #tpu.memory_space<vmem>>, vector<3x32xf32>
    %c0_3 = arith.constant 0 : index
    %c0_4 = arith.constant 0 : index
    %2 = vector.load %arg3[%c0_3, %c0_4] : memref<1x32xf32, #tpu.memory_space<vmem>>, vector<1x32xf32>
    %3 = vector.extract_strided_slice %0 {offsets = [0, 0], sizes = [16, 1], strides = [1, 1]} : vector<16x3xf32> to vector<16x1xf32>
    %4 = vector.extract_strided_slice %1 {offsets = [0, 0], sizes = [1, 32], strides = [1, 1]} : vector<3x32xf32> to vector<1x32xf32>
    %5 = vector.broadcast %3 : vector<16x1xf32> to vector<16x32xf32>
    %6 = vector.broadcast %4 : vector<1x32xf32> to vector<16x32xf32>
    %7 = arith.mulf %5, %6 : vector<16x32xf32>
    %8 = vector.extract_strided_slice %0 {offsets = [0, 1], sizes = [16, 1], strides = [1, 1]} : vector<16x3xf32> to vector<16x1xf32>
    %9 = vector.extract_strided_slice %1 {offsets = [1, 0], sizes = [1, 32], strides = [1, 1]} : vector<3x32xf32> to vector<1x32xf32>
    %10 = vector.broadcast %8 : vector<16x1xf32> to vector<16x32xf32>
    %11 = vector.broadcast %9 : vector<1x32xf32> to vector<16x32xf32>
    %12 = arith.mulf %10, %11 : vector<16x32xf32>
    %13 = arith.addf %7, %12 : vector<16x32xf32>
    %14 = vector.extract_strided_slice %0 {offsets = [0, 2], sizes = [16, 1], strides = [1, 1]} : vector<16x3xf32> to vector<16x1xf32>
    %15 = vector.extract_strided_slice %1 {offsets = [2, 0], sizes = [1, 32], strides = [1, 1]} : vector<3x32xf32> to vector<1x32xf32>
    %16 = vector.broadcast %14 : vector<16x1xf32> to vector<16x32xf32>
    %17 = vector.broadcast %15 : vector<1x32xf32> to vector<16x32xf32>
    %18 = arith.mulf %16, %17 : vector<16x32xf32>
    %19 = arith.addf %13, %18 : vector<16x32xf32>
    %20 = math.cos %19 : vector<16x32xf32>
    %21 = vector.broadcast %2 : vector<1x32xf32> to vector<16x32xf32>
    %22 = arith.mulf %20, %21 : vector<16x32xf32>
    %23 = math.sin %19 : vector<16x32xf32>
    %24 = vector.broadcast %2 : vector<1x32xf32> to vector<16x32xf32>
    %25 = arith.mulf %23, %24 : vector<16x32xf32>
    %26 = tpu.concatenate %22, %25 in 1 : vector<16x32xf32>, vector<16x32xf32> -> vector<16x64xf32>
    %c0_5 = arith.constant 0 : index
    %c0_6 = arith.constant 0 : index
    %27 = vector.load %arg4[%c0_5, %c0_6] : memref<16x64xf32, #tpu.memory_space<vmem>>, vector<16x64xf32>
    tpu.vector_store %arg4[%c0_5, %c0_6], %26 {strides = array<i32>} : memref<16x64xf32, #tpu.memory_space<vmem>>, vector<16x64xf32>,
    return
  }
  func.func @transform_0(%arg0: i32) -> (i32, i32) {
    %c0_i32 = arith.constant 0 : i32
    %c0_i32_0 = arith.constant 0 : i32
    return %arg0, %c0_i32 : i32, i32
  }
  func.func @transform_1(%arg0: i32) -> (i32, i32) {
    %c0_i32 = arith.constant 0 : i32
    %c0_i32_0 = arith.constant 0 : i32
    %c0_i32_1 = arith.constant 0 : i32
    return %c0_i32, %c0_i32_0 : i32, i32
  }
  func.func @transform_2(%arg0: i32) -> (i32, i32) {
    %c0_i32 = arith.constant 0 : i32
    %c0_i32_0 = arith.constant 0 : i32
    %c0_i32_1 = arith.constant 0 : i32
    return %c0_i32, %c0_i32_0 : i32, i32
  }
  func.func @transform_3(%arg0: i32) -> (i32, i32) {
    %c0_i32 = arith.constant 0 : i32
    %c0_i32_0 = arith.constant 0 : i32
    return %arg0, %c0_i32 : i32, i32
  }
}

</mosaic_0001>

<bundles_post_ra>
// kernel: inte_rand_gaus_pallas.1
= control target key start
LH: loop header
LB: loop body
LE: loop exit
PB: predicated region body
PF: predicated region fallthrough
CT: control target
= control target key end

     0   :  { %v593_v1 = vmov 1   ;;  %v594_v2 = vmov 0   ;;  %s703_s0 = inlined_call_operand.vmem [shape: f32[16,3], index: 0, kind: input, shape index: {}]   ;;  %s704_s1 = inlined_call_operand.vmem [shape: f32[3,32], index: 1, kind: input, shape index: {}]   ;;  %s705_s2 = inlined_call_operand.vmem [shape: f32[1,32], index: 2, kind: input, shape index: {}]   ;;  %s706_s3 = inlined_call_operand.hbm [shape: f32[16,64], index: 3, kind: output, shape index: {}]  }
   0x1   :  { %v15_v0 = vld [vmem:[%s703_s0] sm:$0xff]  ;;  %560 = vset.pattern.permute.xlu1 %v593_v1  ;;  %559 = vset.pattern.permute.xlu0 %v594_v2 }
   0x2   :  { %8 = vsyncpa [#allocation3], 0  ;;  %36 = vperm.xlu1 %560, %v15_v0   ;;  %21 = vperm.xlu0 %559, %v15_v0   ;;  %v16_v3 = vld [vmem:[%s703_s0 + $0x8] sm:$0xff]  ;;  %v595_v4 = vmov 2   ;;  %v29_v5 = vlaneseq  ;;  %v17_v9 = vld [vmem:[%s704_s1] sm:$0x7] }
   0x3   :  { %v596_v50 = vmov 683565275   ;;  %v597_v54 = vmov 2475754826   ;;  %v598_v56 = vmov 2131351028  }
   0x4   :  { %v30_v6 = vshrl.u32 %v29_v5, 7  ;;  %v599_v58 = vmov 2102212464   ;;  %v600_v60 = vmov 920167782   ;;  %s602_s18 = smov 32  }
   0x6   :  { %40 = vperm.xlu1 %560, %v16_v3   ;;  %26 = vperm.xlu0 %559, %v16_v3   ;;  %v45_v7 = vsub.s32 1, %v30_v6  ;;  %v31_v8 = vsub.s32 0, %v30_v6  ;;  %v61_v12 = vsub.s32 2, %v30_v6 }
   0x8   :  { %v46_v13 = vrot.slane %v17_v9, %v45_v7  ;;  %v32_v14 = vrot.slane %v17_v9, %v31_v8  ;;  %v62_v17 = vrot.slane %v17_v9, %v61_v12 }
   0xa   :  { %562 = vset.pattern.permute.xlu1 %v595_v4  ;;  %561 = vset.pattern.permute.xlu0 %v595_v4 }
   0xb   :  { %56 = vperm.xlu1 %562, %v16_v3   ;;  %52 = vperm.xlu0 %561, %v15_v0   ;;  %v601_v3 = vmov 1326507024  }
  0x7d   :  { %v37_v10 = vpop.permute.xlu1 %36  ;;  %v22_v11 = vpop.permute.xlu0 %21 }
  0x7e   :  { %v47_v18 = vmul.f32 %v46_v13, %v37_v10  ;;  %v33_v19 = vmul.f32 %v32_v14, %v22_v11 }
  0x80   :  { %v49_v24 = vadd.f32 %v47_v18, %v33_v19 }
  0x81   :  { %v41_v15 = vpop.permute.xlu1 %40  ;;  %v27_v16 = vpop.permute.xlu0 %26 }
  0x82   :  { %v48_v20 = vmul.f32 %v46_v13, %v41_v15  ;;  %v34_v21 = vmul.f32 %v32_v14, %v27_v16 }
  0x84   :  { %v50_v25 = vadd.f32 %v48_v20, %v34_v21 }
  0x86   :  { %v57_v22 = vpop.permute.xlu1 %56  ;;  %v53_v23 = vpop.permute.xlu0 %52 }
  0x87   :  { %v64_v26 = vmul.f32 %v62_v17, %v57_v22  ;;  %v63_v27 = vmul.f32 %v62_v17, %v53_v23 }
  0x89   :  { %v635_v28 = vadd.f32 %v64_v26, %v50_v25  ;;  %v637_v29 = vadd.f32 %v63_v27, %v49_v24 }
  0x8b   :  { %v170_v30 = vand.u32 2147483647, %v635_v28  ;;  %v173_v31 = vand.u32 2139095040, %v635_v28  ;;  %v70_v32 = vand.u32 2139095040, %v637_v29  ;;  %v67_v35 = vand.u32 2147483647, %v637_v29 }
  0x8c   :  { %vm172_vm14 = vcmp.lt.s32.totalorder %v635_v28, 0 }
  0x8d   :  { %v174_v33 = vshrl.u32 %v173_v31, 23  ;;  %v177_v34 = vand.u32 8388607, %v170_v30  ;;  %v71_v36 = vshrl.u32 %v70_v32, 23  ;;  %v647_v41 = vand.u32 8388607, %v67_v35 }
  0x8e   :  { %vm171_vm15 = vcmp.le.f32.partialorder %v170_v30, 0.7853982 }
  0x8f   :  { %v525_v37 = vadd.s32 4294967169, %v174_v33  ;;  %v521_v38 = vadd.s32 4294967169, %v71_v36  ;;  %v178_v40 = vor.u32 8388608, %v177_v34  ;;  %v75_v48 = vor.u32 8388608, %v647_v41 }
  0x91   :  { %v180_v39 = vadd.s32 1, %v525_v37  ;;  %v77_v42 = vadd.s32 1, %v521_v38  ;;  %v649_v47 = vshll.u32 %v178_v40, 8 }
  0x93   :  { %vm181_vm0 = vcmp.gt.s32.totalorder %v180_v39, 0  ;;  %vm78_vm1 = vcmp.gt.s32.totalorder %v77_v42, 0 }
  0x94   :  { %v182_v43 = vsel %vm181_vm0, %v180_v39, 0  ;;  %v79_v46 = vsel %vm78_vm1, %v77_v42, 0  ;;  %v115_v42 = vshll.u32 %v75_v48, 8  ;;  %vm69_vm0 = vcmp.lt.s32.totalorder %v637_v29, 0 }
  0x95   :  { %v183_v44 = vshrl.u32 %v182_v43, 5  ;;  %v184_v45 = vand.u32 31, %v182_v43  ;;  %v652_v52 = vshrl.u32 %v79_v46, 5  ;;  %v81_v53 = vand.u32 31, %v79_v46 }
  0x96   :  { %vm68_vm1 = vcmp.le.f32.partialorder %v67_v35, 0.7853982 }
  0x97   :  { %v185_v49 = vsub.s32 32, %v184_v45  ;;  %v187_v51 = vshll.u32 %v596_v50, %v184_v45  ;;  %v190_v55 = vshll.u32 %v597_v54, %v184_v45  ;;  %v193_v57 = vshll.u32 %v598_v56, %v184_v45 }
  0x98   :  { %v196_v59 = vshll.u32 %v599_v58, %v184_v45  ;;  %v199_v61 = vshll.u32 %v600_v60, %v184_v45  ;;  %vm202_vm2 = vcmp.lt.s32.totalorder %v183_v44, 1  ;;  %vm203_vm3 = vcmp.lt.s32.totalorder %v183_v44, 2 }
  0x99   :  { %v188_v62 = vshrl.u32 %v597_v54, %v185_v49  ;;  %v191_v63 = vshrl.u32 %v598_v56, %v185_v49  ;;  %v194_v0 = vshrl.u32 %v599_v58, %v185_v49  ;;  %v186_v1 = vshrl.u32 %v596_v50, %v185_v49 }
  0x9a   :  { %v197_v2 = vshrl.u32 %v600_v60, %v185_v49  ;;  %v200_v4 = vshrl.u32 %v601_v3, %v185_v49  ;;  %v82_v8 = vsub.s32 32, %v81_v53  ;;  %vm204_vm4 = vcmp.lt.s32.totalorder %v183_v44, 3 }
  0x9b   :  { %v189_v5 = vor.u32 %v188_v62, %v187_v51  ;;  %v192_v6 = vor.u32 %v191_v63, %v190_v55  ;;  %v195_v7 = vor.u32 %v194_v0, %v193_v57  ;;  %vm205_vm5 = vcmp.lt.s32.totalorder %v183_v44, 4 }
  0x9c   :  { %v198_v9 = vor.u32 %v197_v2, %v196_v59  ;;  %v201_v10 = vor.u32 %v200_v4, %v199_v61  ;;  %v84_v18 = vshll.u32 %v596_v50, %v81_v53  ;;  %v85_v21 = vshrl.u32 %v597_v54, %v82_v8 }
  0x9d   :  { %v206_v11 = vsel %vm202_vm2, %v186_v1, %v189_v5  ;;  %v207_v12 = vsel %vm205_vm5, %v195_v7, 2102212464  ;;  %v210_v13 = vsel %vm202_vm2, %v189_v5, %v192_v6  ;;  %v214_v14 = vsel %vm202_vm2, %v192_v6, %v195_v7 }
  0x9e   :  { %v208_v15 = vsel %vm204_vm4, %v192_v6, %v207_v12  ;;  %v211_v16 = vsel %vm205_vm5, %v198_v9, 920167782  ;;  %v215_v17 = vsel %vm205_vm5, %v201_v10, 1326507024  ;;  %v87_v22 = vshll.u32 %v597_v54, %v81_v53 }
  0x9f   :  { %v212_v19 = vsel %vm204_vm4, %v195_v7, %v211_v16  ;;  %v216_v20 = vsel %vm204_vm4, %v198_v9, %v215_v17  ;;  %v209_v23 = vsel %vm203_vm3, %v206_v11, %v208_v15  ;;  %v88_v26 = vshrl.u32 %v598_v56, %v82_v8 }
  0xa0   :  { %v213_v24 = vsel %vm203_vm3, %v210_v13, %v212_v19  ;;  %v217_v25 = vsel %vm203_vm3, %v214_v14, %v216_v20  ;;  %v86_v34 = vor.u32 %v85_v21, %v84_v18  ;;  %v90_v37 = vshll.u32 %v598_v56, %v81_v53 }
  0xa1   :  { %v661_v27 = vmul.u32.u64.low %v649_v47, %v217_v25  ;;  %v662_v31 = vmul.u32.u64.high %v649_v47, %v217_v25, %v661_v27  ;;  %v665_v32 = vmul.u32.u64.low %v649_v47, %v213_v24  ;;  %v666_v33 = vmul.u32.u64.high %v649_v47, %v213_v24, %v665_v32 }
  0xa2   :  { %v89_v36 = vor.u32 %v88_v26, %v87_v22  ;;  %v91_v38 = vshrl.u32 %v599_v58, %v82_v8  ;;  %v93_v39 = vshll.u32 %v599_v58, %v81_v53  ;;  %v94_v40 = vshrl.u32 %v600_v60, %v82_v8 }
  0xa3   :  { %v97_v41 = vshrl.u32 %v601_v3, %v82_v8  ;;  %v225_v43 = vmul.u32 %v649_v47, %v209_v23  ;;  %v83_v44 = vshrl.u32 %v596_v50, %v82_v8  ;;  %v96_v46 = vshll.u32 %v600_v60, %v81_v53 }
  0xa4   :  { %v92_v45 = vor.u32 %v91_v38, %v90_v37  ;;  %vm227_vm6 = vc.u32 %v662_v31, %v665_v32  ;;  %v228_v49 = vadd.s32 1, %v666_v33  ;;  %v95_v51 = vor.u32 %v94_v40, %v93_v39 }
  0xa5   :  { %vm99_vm7 = vcmp.lt.s32.totalorder %v652_v52, 1  ;;  %v98_v54 = vor.u32 %v97_v41, %v96_v46  ;;  %vm101_vm8 = vcmp.lt.s32.totalorder %v652_v52, 3  ;;  %vm102_vm9 = vcmp.lt.s32.totalorder %v652_v52, 4 }
  0xa6   :  { %v107_v55 = vsel %vm99_vm7, %v86_v34, %v89_v36  ;;  %v229_v48 = vsel %vm227_vm6, %v228_v49, %v666_v33  ;;  %v104_v56 = vsel %vm102_vm9, %v92_v45, 2102212464  ;;  %v108_v47 = vsel %vm102_vm9, %v95_v51, 920167782 }
  0xa7   :  { %v111_v50 = vsel %vm99_vm7, %v89_v36, %v92_v45  ;;  %v230_v57 = vadd.s32 %v229_v48, %v225_v43  ;;  %vm100_vm10 = vcmp.lt.s32.totalorder %v652_v52, 2  ;;  %v109_v53 = vsel %vm101_vm8, %v92_v45, %v108_v47 }
  0xa8   :  { %v112_v58 = vsel %vm102_vm9, %v98_v54, 1326507024  ;;  %v103_v59 = vsel %vm99_vm7, %v83_v44, %v86_v34  ;;  %v105_v60 = vsel %vm101_vm8, %v89_v36, %v104_v56  ;;  %v110_v61 = vsel %vm100_vm10, %v107_v55, %v109_v53 }
  0xa9   :  { %v113_v62 = vsel %vm101_vm8, %v95_v51, %v112_v58  ;;  %v231_v63 = vadd.s32 536870912, %v230_v57  ;;  %v676_v1 = vmul.u32.u64.low %v115_v42, %v110_v61  ;;  %v677_v2 = vmul.u32.u64.high %v115_v42, %v110_v61, %v676_v1 }
  0xaa   :  { %v114_v0 = vsel %vm100_vm10, %v111_v50, %v113_v62  ;;  %v106_v6 = vsel %vm100_vm10, %v103_v59, %v105_v60  ;;  %v226_v22 = vadd.s32 %v665_v32, %v662_v31  ;;  %vm262_vm8 = vweird.f32 %v635_v28 }
  0xab   :  { %v679_v3 = vmul.u32.u64.low %v115_v42, %v114_v0  ;;  %v680_v4 = vmul.u32.u64.high %v115_v42, %v114_v0, %v679_v3  ;;  %v232_v5 = vshrl.u32 %v231_v63, 30  ;;  %v125_v8 = vadd.s32 1, %v677_v2 }
  0xac   :  { %v122_v52 = vmul.u32 %v115_v42, %v106_v6 }
  0xad   :  { %v233_v7 = vshll.u32 %v232_v5, 30  ;;  %vm124_vm11 = vc.u32 %v680_v4, %v676_v1  ;;  %v123_v43 = vadd.s32 %v676_v1, %v680_v4  ;;  %v256_v48 = vsub.s32 4, %v232_v5 }
  0xae   :  { %v126_v10 = vsel %vm124_vm11, %v125_v8, %v677_v2 }
  0xaf   :  { %v234_v9 = vsub.s32 %v230_v57, %v233_v7  ;;  %v127_v11 = vadd.s32 %v126_v10, %v122_v52  ;;  %v257_v58 = vsel %vm172_vm14, %v256_v48, %v232_v5  ;;  %v529_v10 = vld [vmem:[%s705_s2] ss:$0 sm:$0xff]  ;;  %s603_s2 = smov [#allocation2]  }
  0xb0   :  { %v259_v60 = vsel %vm171_vm15, 0, %v257_v58  ;;  %s510_s19 = sshll.u32 %s603_s2, 4  ;;  %s511_s19 = int_to_ptr.vmem [resolvable:$true] %s510_s19 }
  0xb1   :  { %v236_v12 = vsub.s32 0, %v234_v9  ;;  %v128_v13 = vadd.s32 536870912, %v127_v11  ;;  %v478_v30 = vadd.s32 3, %v259_v60  ;;  %v263_v2 = vand.u32 3, %v259_v60  ;;  %s571_s20 = scalar_lea.vmem %s511_s19, 256  ;;  %p576_p1 = scmp.lt.s32.totalorder %s511_s19, %s511_s19 }
  0xb2   :  { %p572_p0 = scmp.ne.s32.totalorder %s511_s19, %s571_s20  ;;  %p577_p2 = scmp.lt.s32.totalorder %s571_s20, %s571_s20 }
  0xb3   :  { %v526_v14 = vmin.u32 %v236_v12, %v234_v9  ;;  %v129_v15 = vshrl.u32 %v128_v13, 30  ;;  %v479_v3 = vand.u32 3, %v478_v30  ;;  %vm265_vm2 = vcmp.eq.s32.totalorder %v263_v2, 0 }
  0xb4   :  { %vm268_vm3 = vcmp.eq.s32.totalorder %v263_v2, 2  ;;  %vm264_vm6 = vcmp.lt.s32.totalorder %v263_v2, 2  ;;  %p578_p3 = por %p577_p2, %p576_p1 }
  0xb5   :  { %v238_v16 = vclz %v526_v14  ;;  %v130_v17 = vshll.u32 %v129_v15, 30  ;;  %v153_v62 = vsub.s32 4, %v129_v15  ;;  %vm484_vm4 = vcmp.eq.s32.totalorder %v479_v3, 2 }
  0xb6   :  { %vm481_vm5 = vcmp.eq.s32.totalorder %v479_v3, 0  ;;  %vm480_vm7 = vcmp.lt.s32.totalorder %v479_v3, 2  ;;  %p579_p4 = pnand %p578_p3, %p572_p0 }
  0xb7   :  { %v527_v18 = vadd.s32 4294967294, %v238_v16  ;;  %v131_v19 = vsub.s32 %v127_v11, %v130_v17  ;;  %v154_v1 = vsel %vm69_vm0, %v153_v62, %v129_v15 }
  0xb8   :  { %v156_v5 = vsel %vm68_vm1, 0, %v154_v1 }
  0xb9   :  { %vm528_vm12 = vcmp.lt.s32.totalorder %v527_v18, 0  ;;  %v133_v21 = vsub.s32 0, %v131_v19 }
  0xba   :  { %v241_v20 = vsel %vm528_vm12, 0, %v527_v18  ;;  %v160_v18 = vand.u32 3, %v156_v5 }
  0xbb   :  { %v242_v23 = vsub.s32 32, %v241_v20  ;;  %v246_v24 = vsub.s32 4294967266, %v241_v20  ;;  %v522_v25 = vmin.u32 %v133_v21, %v131_v19  ;;  %v243_v26 = vshll.u32 %v234_v9, %v241_v20 }
  0xbc   :  { %v374_v9 = vadd.s32 3, %v156_v5  ;;  %vm165_vm9 = vcmp.eq.s32.totalorder %v160_v18, 2  ;;  %vm162_vm11 = vcmp.eq.s32.totalorder %v160_v18, 0 }
  0xbd   :  { %v244_v27 = vshrl.u32 %v226_v22, %v242_v23  ;;  %v247_v33 = vadd.s32 127, %v246_v24  ;;  %v135_v34 = vclz %v522_v25 }
  0xbf   :  { %v245_v36 = vor.u32 %v244_v27, %v243_v26  ;;  %v248_v37 = vshll.u32 %v247_v33, 23  ;;  %v523_v38 = vadd.s32 4294967294, %v135_v34 }
  0xc1   :  { %v249_v39 = vor.u32 4788187, %v248_v37  ;;  %vm524_vm13 = vcmp.lt.s32.totalorder %v523_v38, 0  ;;  %v252_v41 = vcvt.s32.f32 %v245_v36 }
  0xc2   :  { %v138_v42 = vsel %vm524_vm13, 0, %v523_v38  ;;  %vm161_vm13 = vcmp.lt.s32.totalorder %v160_v18, 2 }
  0xc3   :  { %v250_v40 = vand.u32 2147483647, %v249_v39  ;;  %v139_v44 = vsub.s32 32, %v138_v42  ;;  %v143_v45 = vsub.s32 4294967266, %v138_v42  ;;  %v140_v32 = vshll.u32 %v131_v19, %v138_v42 }
  0xc4   :  { %v375_v19 = vand.u32 3, %v374_v9 }
  0xc5   :  { %v253_v31 = vmul.f32 %v252_v41, %v250_v40  ;;  %v141_v46 = vshrl.u32 %v123_v43, %v139_v44  ;;  %v144_v49 = vadd.s32 127, %v143_v45 }
  0xc6   :  { %vm380_vm10 = vcmp.eq.s32.totalorder %v375_v19, 2  ;;  %vm377_vm12 = vcmp.eq.s32.totalorder %v375_v19, 0 }
  0xc7   :  { %v254_v51 = vxor.u32 2147483648, %v253_v31  ;;  %v142_v54 = vor.u32 %v141_v46, %v140_v32  ;;  %v145_v55 = vshll.u32 %v144_v49, 23 }
  0xc9   :  { %v255_v56 = vsel %vm172_vm14, %v254_v51, %v253_v31  ;;  %v146_v50 = vor.u32 4788187, %v145_v55  ;;  %v149_v53 = vcvt.s32.f32 %v142_v54  ;;  %vm376_vm14 = vcmp.lt.s32.totalorder %v375_v19, 2 }
  0xca   :  { %v258_v47 = vsel %vm171_vm15, %v635_v28, %v255_v56  ;;  %vm159_vm15 = vweird.f32 %v637_v29 }
  0xcb   :  { %563 = vcosq.f32 %v258_v47  ;;  %v147_v57 = vand.u32 2147483647, %v146_v50 }
  0xcc   :  { %565 = vsinq.f32 %v258_v47 }
  0xcd   :  { %v150_v59 = vmul.f32 %v149_v53, %v147_v57 }
  0xcf   :  { %v151_v61 = vxor.u32 2147483648, %v150_v59 }
  0xd1   :  { %v152_v63 = vsel %vm69_vm0, %v151_v61, %v150_v59  ;;  %vm499_vm0 = vcmask 261120  }
  0xd2   :  { %v155_v0 = vsel %vm68_vm1, %v637_v29, %v152_v63  ;;  %vm502_vm1 = vcmask 523264  }
  0xd3   :  { %567 = vcosq.f32 %v155_v0 }
  0xd4   :  { %569 = vsinq.f32 %v155_v0 }
  0xd8   :  { %v564_v4 = vpop.eup %563 }
  0xd9   :  { %v566_v6 = vpop.eup %565  ;;  %v269_v7 = vxor.u32 2147483648, %v564_v4 }
  0xda   :  { %v266_v8 = vxor.u32 2147483648, %v566_v6 }
  0xdb   :  { %v486_v52 = vsel %vm484_vm4, %v269_v7, %v566_v6  ;;  %v270_v35 = vsel %vm268_vm3, %v269_v7, %v566_v6 }
  0xdc   :  { %v483_v11 = vsel %vm481_vm5, %v564_v4, %v266_v8  ;;  %v267_v12 = vsel %vm265_vm2, %v564_v4, %v266_v8 }
  0xdd   :  { %v487_v13 = vsel %vm480_vm7, %v483_v11, %v486_v52  ;;  %v271_v14 = vsel %vm264_vm6, %v267_v12, %v270_v35 }
  0xde   :  { %v488_v15 = vsel %vm262_vm8, nan, %v487_v13  ;;  %v272_v16 = vsel %vm262_vm8, nan, %v271_v14 }
  0xdf   :  { %v490_v17 = vmul.f32 %v529_v10, %v488_v15  ;;  %v280_v20 = vmul.f32 %v529_v10, %v272_v16 }
  0xe0   :  { %v568_v21 = vpop.eup %567 }
  0xe1   :  { %495 = vrot.lane.b32.xlu0 %v490_v17, %s602_s18  ;;  %v570_v22 = vpop.eup %569  ;;  %v166_v23 = vxor.u32 2147483648, %v568_v21 }
  0xe2   :  { %v163_v24 = vxor.u32 2147483648, %v570_v22 }
  0xe3   :  { %v382_v25 = vsel %vm380_vm10, %v166_v23, %v570_v22  ;;  %v167_v28 = vsel %vm165_vm9, %v166_v23, %v570_v22 }
  0xe4   :  { %v379_v26 = vsel %vm377_vm12, %v568_v21, %v163_v24  ;;  %v164_v27 = vsel %vm162_vm11, %v568_v21, %v163_v24 }
  0xe5   :  { %v383_v33 = vsel %vm376_vm14, %v379_v26, %v382_v25  ;;  %v168_v34 = vsel %vm161_vm13, %v164_v27, %v167_v28 }
  0xe6   :  { %v384_v36 = vsel %vm159_vm15, nan, %v383_v33  ;;  %v169_v37 = vsel %vm159_vm15, nan, %v168_v34 }
  0xe7   :  { %v489_v38 = vmul.f32 %v529_v10, %v384_v36  ;;  %v279_v39 = vmul.f32 %v529_v10, %v169_v37 }
  0xe9   :  { %493 = vrot.lane.b32.xlu1 %v489_v38, %s602_s18 }
 0x153   :  { %v496_v40 = vpop.permute.xlu0 %495 }
 0x154   :  { %v501_v41 = vsel %vm499_vm0, %v280_v20, %v496_v40 }
 0x155   :  { %504 = vst.msk [vmem:[#allocation2 + $0x8] sm:$0xff] %vm502_vm1, %v501_v41 }
 0x15b   :  { %v494_v42 = vpop.permute.xlu1 %493 }
 0x15c   :  { %v500_v43 = vsel %vm499_vm0, %v279_v39, %v494_v42 }
 0x15d   :  { %503 = vst.msk [vmem:[#allocation2] sm:$0xff] %vm502_vm1, %v500_v43 }
 0x15e   :  { %582 = shalt.err (!%p579_p4)
}
 0x15f   :  { %s604_s21 = smov 128   ;;  %s605_s22 = smov 8  }
 0x160   :  { %516 = dma.vmem_to_hbm [thread:$0]  %s511_s19, 256, %s706_s3, [#allocation3], %s604_s21, %s604_s21, %s605_s22  }
 0x161   :  { %591 = dma.done.wait [#allocation3], 256  }
 0x162   :  { %592 = vsyncadd [#allocation3], 4294967040 }
 0x163   :  { %520 = vsyncpa [#allocation3], 1 }

</bundles_post_ra>
